<compile_context>
chip_gen: v6e
topology: v6e:2x2x1
jax: 0.10.0
libtpu: 0.0.40
codegen_flags: <defaults>
</compile_context>

<pallas_src>
import math

import jax
import jax.numpy as jnp
from jax.experimental import pallas as pl
from jax.experimental.pallas import tpu as pltpu

# Original (PyTorch) dims
IN_DIM = 28 * 28   # 784
H1_DIM = 256
H2_DIM = 64
OUT_DIM = 10

# Lane-padded dims (multiples of 128)
K_PAD = 896        # 784 -> 896
H1_PAD = 256       # already lane-aligned
H2_PAD = 128       # 64  -> 128
OUT_PAD = 128      # 10  -> 128


def _round_up(n, m):
    return ((n + m - 1) // m) * m


def mlp_kernel(x_ref, w1_ref, b1_ref, w2_ref, b2_ref, w3_ref, b3_ref, o_ref):
    # fc1 + ReLU: bf16 operands on the MXU, f32 accumulation, f32 bias add.
    h1 = jnp.dot(x_ref[...], w1_ref[...], preferred_element_type=jnp.float32)
    h1 = jnp.maximum(h1 + b1_ref[...], 0.0)
    # fc2 + ReLU
    h2 = jnp.dot(h1.astype(jnp.bfloat16), w2_ref[...],
                 preferred_element_type=jnp.float32)
    h2 = jnp.maximum(h2 + b2_ref[...], 0.0)
    # fc3 (logits, no activation)
    h3 = jnp.dot(h2.astype(jnp.bfloat16), w3_ref[...],
                 preferred_element_type=jnp.float32)
    o_ref[...] = (h3 + b3_ref[...]).astype(o_ref.dtype)


def prepare_params(params):
    """One-time conversion from PyTorch nn.Linear layout (w: [out,in], b: [out])
    to kernel layout: pre-transposed [in,out], zero-padded to lane multiples,
    weights in bf16, biases in f32.  Hoisted out of the per-call path."""
    w1t = jnp.pad(params["w1"].T, ((0, K_PAD - IN_DIM), (0, 0)))          # [896,256]
    w2t = jnp.pad(params["w2"].T, ((0, 0), (0, H2_PAD - H2_DIM)))         # [256,128]
    w3t = jnp.pad(params["w3"].T, ((0, H2_PAD - H2_DIM),
                                   (0, OUT_PAD - OUT_DIM)))               # [128,128]
    b1 = params["b1"].reshape(1, -1).astype(jnp.float32)                  # [1,256]
    b2 = jnp.pad(params["b2"], (0, H2_PAD - H2_DIM)).reshape(1, -1).astype(jnp.float32)
    b3 = jnp.pad(params["b3"], (0, OUT_PAD - OUT_DIM)).reshape(1, -1).astype(jnp.float32)
    return dict(w1t=w1t.astype(jnp.bfloat16), b1=b1,
                w2t=w2t.astype(jnp.bfloat16), b2=b2,
                w3t=w3t.astype(jnp.bfloat16), b3=b3)


def net_forward(x, kparams, *, batch_tile=128):
    """x: [B, 784] float32.  kparams: output of prepare_params.
    Returns logits [B, 10] float32."""
    B = x.shape[0]
    # Batch tile: at least one 8-row sublane tile, at most `batch_tile` rows.
    tb = min(batch_tile, _round_up(B, 8))
    Bp = _round_up(B, tb)

    # Pad batch & feature dims, bf16 activations (halves input DMA bytes).
    xp = jnp.pad(x, ((0, Bp - B), (0, K_PAD - IN_DIM))).astype(jnp.bfloat16)

    weight_elems = K_PAD * H1_PAD + H1_PAD * H2_PAD + H2_PAD * OUT_PAD
    flops = 2 * Bp * weight_elems
    bytes_accessed = (Bp * K_PAD * 2                       # x (bf16)
                      + weight_elems * 2                   # weights (bf16)
                      + (H1_PAD + H2_PAD + OUT_PAD) * 4    # biases (f32)
                      + Bp * OUT_PAD * 4)                  # logits (f32)

    out = pl.pallas_call(
        mlp_kernel,
        out_shape=jax.ShapeDtypeStruct((Bp, OUT_PAD), jnp.float32),
        grid=(Bp // tb,),
        in_specs=[
            pl.BlockSpec((tb, K_PAD), lambda i: (i, 0)),         # x batch tile
            pl.BlockSpec((K_PAD, H1_PAD), lambda i: (0, 0)),     # w1 (VMEM-resident)
            pl.BlockSpec((1, H1_PAD), lambda i: (0, 0)),         # b1
            pl.BlockSpec((H1_PAD, H2_PAD), lambda i: (0, 0)),    # w2
            pl.BlockSpec((1, H2_PAD), lambda i: (0, 0)),         # b2
            pl.BlockSpec((H2_PAD, OUT_PAD), lambda i: (0, 0)),   # w3
            pl.BlockSpec((1, OUT_PAD), lambda i: (0, 0)),        # b3
        ],
        out_specs=pl.BlockSpec((tb, OUT_PAD), lambda i: (i, 0)),
        compiler_params=pltpu.CompilerParams(
            dimension_semantics=("parallel",)),
        cost_estimate=pl.CostEstimate(
            flops=flops, transcendentals=0, bytes_accessed=bytes_accessed),
    )(xp, kparams["w1t"], kparams["b1"], kparams["w2t"], kparams["b2"],
      kparams["w3t"], kparams["b3"])

    return out[:B, :OUT_DIM]


def init_params(key):
    """Deterministic PyTorch-style (Kaiming-uniform) init for the 3 Linears."""
    dims = [(H1_DIM, IN_DIM), (H2_DIM, H1_DIM), (OUT_DIM, H2_DIM)]  # (out, in)
    params = {}
    for i, (out_d, in_d) in enumerate(dims, start=1):
        key, kw, kb = jax.random.split(key, 3)
        bound = 1.0 / math.sqrt(in_d)
        params[f"w{i}"] = jax.random.uniform(
            kw, (out_d, in_d), jnp.float32, minval=-bound, maxval=bound)
        params[f"b{i}"] = jax.random.uniform(
            kb, (out_d,), jnp.float32, minval=-bound, maxval=bound)
    return params


if __name__ == "__main__":
    key = jax.random.PRNGKey(0)
    key, kx = jax.random.split(key)

    B = 8  # small demo batch (kernel auto-tiles/pads; use B>=128 for MXU occupancy)
    x = jax.random.normal(kx, (B, IN_DIM), jnp.float32)

    params = init_params(key)
    kparams = prepare_params(params)       # one-time: transpose/pad/bf16-cast

    out = net_forward(x, kparams)
    out = jax.block_until_ready(out)
    assert out.shape == (B, OUT_DIM)

    # Reference with matching bf16-operand / f32-accumulation semantics.
    xb = x.astype(jnp.bfloat16)
    h = jnp.maximum(
        jnp.dot(xb, params["w1"].astype(jnp.bfloat16).T,
                preferred_element_type=jnp.float32) + params["b1"], 0.0)
    h = jnp.maximum(
        jnp.dot(h.astype(jnp.bfloat16), params["w2"].astype(jnp.bfloat16).T,
                preferred_element_type=jnp.float32) + params["b2"], 0.0)
    ref = jnp.dot(h.astype(jnp.bfloat16), params["w3"].astype(jnp.bfloat16).T,
                  preferred_element_type=jnp.float32) + params["b3"]

    assert jnp.allclose(out, ref, atol=1e-2, rtol=1e-2), (
        float(jnp.max(jnp.abs(out - ref))))

    print("KERNEL_OK")
</pallas_src>

<mosaic_0001>
module attributes {stable_mosaic.version = 11 : i64} {
  func.func @mlp_kernel(%arg0: i32, %arg1: memref<8x896xbf16, #tpu.memory_space<vmem>>, %arg2: memref<896x256xbf16, #tpu.memory_space<vmem>>, %arg3: memref<1x256xf32, #tpu.memory_space<vmem>>, %arg4: memref<256x128xbf16, #tpu.memory_space<vmem>>, %arg5: memref<1x128xf32, #tpu.memory_space<vmem>>, %arg6: memref<128x128xbf16, #tpu.memory_space<vmem>>, %arg7: memref<1x128xf32, #tpu.memory_space<vmem>>, %arg8: memref<8x128xf32, #tpu.memory_space<vmem>>) attributes {dimension_semantics = [#tpu.dimension_semantics<parallel>], iteration_bounds = array<i64: 1>, scalar_prefetch = 0 : i64, scratch_operands = 0 : i64, tpu.core_type = #tpu.core_type<tc>, window_params = [{transform_indices = @transform_0, window_bounds = array<i64: 8, 896>}, {pipeline_mode = #tpu.pipeline_mode<synchronous>, transform_indices = @transform_1, window_bounds = array<i64: 896, 256>}, {pipeline_mode = #tpu.pipeline_mode<synchronous>, transform_indices = @transform_2, window_bounds = array<i64: 1, 256>}, {pipeline_mode = #tpu.pipeline_mode<synchronous>, transform_indices = @transform_3, window_bounds = array<i64: 256, 128>}, {pipeline_mode = #tpu.pipeline_mode<synchronous>, transform_indices = @transform_4, window_bounds = array<i64: 1, 128>}, {pipeline_mode = #tpu.pipeline_mode<synchronous>, transform_indices = @transform_5, window_bounds = array<i64: 128, 128>}, {pipeline_mode = #tpu.pipeline_mode<synchronous>, transform_indices = @transform_6, window_bounds = array<i64: 1, 128>}, {transform_indices = @transform_7, window_bounds = array<i64: 8, 128>}]} {
    %c0 = arith.constant 0 : index
    %c0_0 = arith.constant 0 : index
    %0 = vector.load %arg1[%c0, %c0_0] : memref<8x896xbf16, #tpu.memory_space<vmem>>, vector<8x896xbf16>
    %c0_1 = arith.constant 0 : index
    %c0_2 = arith.constant 0 : index
    %1 = vector.load %arg2[%c0_1, %c0_2] : memref<896x256xbf16, #tpu.memory_space<vmem>>, vector<896x256xbf16>
    %cst = arith.constant dense<0.000000e+00> : vector<8x256xf32>
    %2 = tpu.matmul %0, %1, %cst {dimension_numbers = #tpu.dot_dimension_numbers<[1], [0], [0], [1], [0, 0, 1, 1], [], []>} : vector<8x896xbf16>, vector<896x256xbf16>, vector<8x256xf32> -> vector<8x256xf32>
    %c0_3 = arith.constant 0 : index
    %c0_4 = arith.constant 0 : index
    %3 = vector.load %arg3[%c0_3, %c0_4] : memref<1x256xf32, #tpu.memory_space<vmem>>, vector<1x256xf32>
    %4 = vector.broadcast %3 : vector<1x256xf32> to vector<8x256xf32>
    %5 = arith.addf %2, %4 : vector<8x256xf32>
    %cst_5 = arith.constant 0.000000e+00 : f32
    %6 = vector.broadcast %cst_5 : f32 to vector<8x256xf32>
    %7 = arith.maximumf %5, %6 : vector<8x256xf32>
    %8 = arith.truncf %7 : vector<8x256xf32> to vector<8x256xbf16>
    %c0_6 = arith.constant 0 : index
    %c0_7 = arith.constant 0 : index
    %9 = vector.load %arg4[%c0_6, %c0_7] : memref<256x128xbf16, #tpu.memory_space<vmem>>, vector<256x128xbf16>
    %cst_8 = arith.constant dense<0.000000e+00> : vector<8x128xf32>
    %10 = tpu.matmul %8, %9, %cst_8 {dimension_numbers = #tpu.dot_dimension_numbers<[1], [0], [0], [1], [0, 0, 1, 1], [], []>} : vector<8x256xbf16>, vector<256x128xbf16>, vector<8x128xf32> -> vector<8x128xf32>
    %c0_9 = arith.constant 0 : index
    %c0_10 = arith.constant 0 : index
    %11 = vector.load %arg5[%c0_9, %c0_10] : memref<1x128xf32, #tpu.memory_space<vmem>>, vector<1x128xf32>
    %12 = vector.broadcast %11 : vector<1x128xf32> to vector<8x128xf32>
    %13 = arith.addf %10, %12 : vector<8x128xf32>
    %cst_11 = arith.constant 0.000000e+00 : f32
    %14 = vector.broadcast %cst_11 : f32 to vector<8x128xf32>
    %15 = arith.maximumf %13, %14 : vector<8x128xf32>
    %16 = arith.truncf %15 : vector<8x128xf32> to vector<8x128xbf16>
    %c0_12 = arith.constant 0 : index
    %c0_13 = arith.constant 0 : index
    %17 = vector.load %arg6[%c0_12, %c0_13] : memref<128x128xbf16, #tpu.memory_space<vmem>>, vector<128x128xbf16>
    %cst_14 = arith.constant dense<0.000000e+00> : vector<8x128xf32>
    %18 = tpu.matmul %16, %17, %cst_14 {dimension_numbers = #tpu.dot_dimension_numbers<[1], [0], [0], [1], [0, 0, 1, 1], [], []>} : vector<8x128xbf16>, vector<128x128xbf16>, vector<8x128xf32> -> vector<8x128xf32>
    %c0_15 = arith.constant 0 : index
    %c0_16 = arith.constant 0 : index
    %19 = vector.load %arg7[%c0_15, %c0_16] : memref<1x128xf32, #tpu.memory_space<vmem>>, vector<1x128xf32>
    %20 = vector.broadcast %19 : vector<1x128xf32> to vector<8x128xf32>
    %21 = arith.addf %18, %20 : vector<8x128xf32>
    %c0_17 = arith.constant 0 : index
    %c0_18 = arith.constant 0 : index
    %22 = vector.load %arg8[%c0_17, %c0_18] : memref<8x128xf32, #tpu.memory_space<vmem>>, vector<8x128xf32>
    tpu.vector_store %arg8[%c0_17, %c0_18], %21 {strides = array<i32>} : memref<8x128xf32, #tpu.memory_space<vmem>>, vector<8x128xf32>,
    return
  }
  func.func @transform_0(%arg0: i32) -> (i32, i32) {
    %c0_i32 = arith.constant 0 : i32
    %c0_i32_0 = arith.constant 0 : i32
    return %arg0, %c0_i32 : i32, i32
  }
  func.func @transform_1(%arg0: i32) -> (i32, i32) {
    %c0_i32 = arith.constant 0 : i32
    %c0_i32_0 = arith.constant 0 : i32
    %c0_i32_1 = arith.constant 0 : i32
    return %c0_i32, %c0_i32_0 : i32, i32
  }
  func.func @transform_2(%arg0: i32) -> (i32, i32) {
    %c0_i32 = arith.constant 0 : i32
    %c0_i32_0 = arith.constant 0 : i32
    %c0_i32_1 = arith.constant 0 : i32
    return %c0_i32, %c0_i32_0 : i32, i32
  }
  func.func @transform_3(%arg0: i32) -> (i32, i32) {
    %c0_i32 = arith.constant 0 : i32
    %c0_i32_0 = arith.constant 0 : i32
    %c0_i32_1 = arith.constant 0 : i32
    return %c0_i32, %c0_i32_0 : i32, i32
  }
  func.func @transform_4(%arg0: i32) -> (i32, i32) {
    %c0_i32 = arith.constant 0 : i32
    %c0_i32_0 = arith.constant 0 : i32
    %c0_i32_1 = arith.constant 0 : i32
    return %c0_i32, %c0_i32_0 : i32, i32
  }
  func.func @transform_5(%arg0: i32) -> (i32, i32) {
    %c0_i32 = arith.constant 0 : i32
    %c0_i32_0 = arith.constant 0 : i32
    %c0_i32_1 = arith.constant 0 : i32
    return %c0_i32, %c0_i32_0 : i32, i32
  }
  func.func @transform_6(%arg0: i32) -> (i32, i32) {
    %c0_i32 = arith.constant 0 : i32
    %c0_i32_0 = arith.constant 0 : i32
    %c0_i32_1 = arith.constant 0 : i32
    return %c0_i32, %c0_i32_0 : i32, i32
  }
  func.func @transform_7(%arg0: i32) -> (i32, i32) {
    %c0_i32 = arith.constant 0 : i32
    %c0_i32_0 = arith.constant 0 : i32
    return %arg0, %c0_i32 : i32, i32
  }
}

</mosaic_0001>

<bundles_post_ra>
// kernel: tpu_custom_call.1
= control target key start
LH: loop header
LB: loop body
LE: loop exit
PB: predicated region body
PF: predicated region fallthrough
CT: control target
= control target key end

     0   :  { %12 = vsyncpa [#allocation3], 0  ;;  %s1865_s0 = inlined_call_operand.hbm [shape: bf16[8,896], index: 0, kind: input, shape index: {}]   ;;  %s1866_s1 = inlined_call_operand.hbm [shape: bf16[896,256], index: 1, kind: input, shape index: {}]   ;;  %s1867_s2 = inlined_call_operand.vmem [shape: f32[1,256], index: 2, kind: input, shape index: {}]   ;;  %s1868_s3 = inlined_call_operand.hbm [shape: bf16[256,128], index: 3, kind: input, shape index: {}]   ;;  %s1869_s4 = inlined_call_operand.vmem [shape: f32[1,128], index: 4, kind: input, shape index: {}]   ;;  %s1870_s5 = inlined_call_operand.hbm [shape: bf16[128,128], index: 5, kind: input, shape index: {}]   ;;  %s1871_s6 = inlined_call_operand.vmem [shape: f32[1,128], index: 6, kind: input, shape index: {}]   ;;  %s1872_s7 = inlined_call_operand.hbm [shape: f32[8,128], index: 7, kind: output, shape index: {}]  }
   0x1   :  { %13 = vsyncpa [#allocation6], 0 }
   0x2   :  { %14 = vsyncpa [#allocation9], 0 }
   0x3   :  { %15 = vsyncpa [#allocation4], 0  ;;  %s1783_s24 = smov [#allocation5]  }
   0x4   :  { %s31_s25 = sshll.u32 %s1783_s24, 4  ;;  %s32_s25 = int_to_ptr.vmem [resolvable:$true] %s31_s25 }
   0x5   :  { %s1683_s26 = scalar_lea.vmem %s32_s25, 14336  ;;  %p1688_p1 = scmp.lt.s32.totalorder %s32_s25, %s32_s25 }
   0x6   :  { %p1684_p0 = scmp.ne.s32.totalorder %s32_s25, %s1683_s26  ;;  %p1689_p2 = scmp.lt.s32.totalorder %s1683_s26, %s1683_s26 }
   0x8   :  { %p1690_p3 = por %p1689_p2, %p1688_p1 }
   0xa   :  { %p1691_p4 = pnand %p1690_p3, %p1684_p0 }
   0xc   :  { %1694 = shalt.err (!%p1691_p4)
}
   0xd   :  { %s1784_s27 = smov 128   ;;  %s1785_s28 = smov 8  }
   0xe   :  { %37 = dma.hbm_to_vmem [thread:$0]  %s1866_s1, 14336, %s32_s25, [#allocation6], %s1784_s27, %s1784_s27, %s1785_s28  }
   0xf   :  { %s1786_s8 = smov [#allocation2]   ;;  %s1787_s10 = smov [#allocation7]  }
  0x10   :  { %s22_s9 = sshll.u32 %s1786_s8, 4  ;;  %s45_s11 = sshll.u32 %s1787_s10, 4  ;;  %s23_s9 = int_to_ptr.vmem [resolvable:$true] %s22_s9  ;;  %s46_s11 = int_to_ptr.vmem [resolvable:$true] %s45_s11 }
  0x11   :  { %s1703_s12 = scalar_lea.vmem %s23_s9, 448  ;;  %p1708_p6 = scmp.lt.s32.totalorder %s23_s9, %s23_s9 }
  0x12   :  { %p1704_p5 = scmp.ne.s32.totalorder %s23_s9, %s1703_s12  ;;  %p1709_p7 = scmp.lt.s32.totalorder %s1703_s12, %s1703_s12 }
  0x14   :  { %p1710_p8 = por %p1709_p7, %p1708_p6 }
  0x16   :  { %p1711_p9 = pnand %p1710_p8, %p1704_p5 }
  0x18   :  { %1714 = shalt.err (!%p1711_p9)
}
  0x19   :  { %25 = dma.hbm_to_vmem [thread:$0]  %s1865_s0, 448, %s23_s9, [#allocation3]  }
  0x1a   :  { %s1723_s15 = scalar_lea.vmem %s46_s11, 2048  ;;  %p1728_p11 = scmp.lt.s32.totalorder %s46_s11, %s46_s11 }
  0x1b   :  { %p1724_p10 = scmp.ne.s32.totalorder %s46_s11, %s1723_s15  ;;  %p1729_p12 = scmp.lt.s32.totalorder %s1723_s15, %s1723_s15 }
  0x1d   :  { %p1730_p13 = por %p1729_p12, %p1728_p11 }
  0x1f   :  { %p1731_p0 = pnand %p1730_p13, %p1724_p10 }
  0x21   :  { %1734 = shalt.err (!%p1731_p0)
}
  0x22   :  { %s1788_s1 = smov 64   ;;  %s1789_s16 = smov 4  }
  0x23   :  { %51 = dma.hbm_to_vmem [thread:$0]  %s1868_s3, 2048, %s46_s11, [#allocation6], %s1788_s1, %s1788_s1, %s1789_s16  }
  0x24   :  { %s1790_s19 = smov [#allocation8]  }
  0x25   :  { %s59_s20 = sshll.u32 %s1790_s19, 4  ;;  %s60_s20 = int_to_ptr.vmem [resolvable:$true] %s59_s20 }
  0x26   :  { %s1743_s21 = scalar_lea.vmem %s60_s20, 1024  ;;  %p1748_p2 = scmp.lt.s32.totalorder %s60_s20, %s60_s20 }
  0x27   :  { %p1744_p1 = scmp.ne.s32.totalorder %s60_s20, %s1743_s21  ;;  %p1749_p3 = scmp.lt.s32.totalorder %s1743_s21, %s1743_s21 }
  0x29   :  { %p1750_p4 = por %p1749_p3, %p1748_p2 }
  0x2b   :  { %p1751_p5 = pnand %p1750_p4, %p1744_p1 }
  0x2d   :  { %1754 = shalt.err (!%p1751_p5)
}
  0x2e   :  { %65 = dma.hbm_to_vmem [thread:$0]  %s1870_s5, 1024, %s60_s20, [#allocation9], %s1788_s1, %s1788_s1, %s1789_s16  }
  0x2f   :  { %1775 = dma.done.wait [#allocation3], 448  }
  0x30   :  { %1776 = vsyncadd [#allocation3], 4294966848 }
  0x31   :  { %1777 = dma.done.wait [#allocation6], 16384  }
  0x32   :  { %1778 = vsyncadd [#allocation6], 4294950912 }
  0x33   :  { %1779 = dma.done.wait [#allocation9], 1024  }
  0x34   :  { %1780 = vsyncadd [#allocation9], 4294966272  ;;  %v1476_v0 = vld [vmem:[#allocation5 + $0x74] ss:$8 sps:$4 sm:$0xff]   ;;  %v1478_v1 = vld [vmem:[#allocation5 + $0x70] ss:$8 sps:$4 sm:$0xff]  }
  0x35   :  { %794 = vmatprep.subr.bf16.mxu0 %v1476_v0  ;;  %v1479_v2 = vld [vmem:[#allocation5 + $0x174] ss:$8 sps:$4 sm:$0xff]   ;;  %v1481_v3 = vld [vmem:[#allocation5 + $0x170] ss:$8 sps:$4 sm:$0xff]   ;;  %v1482_v4 = vld [vmem:[#allocation5 + $0x64] ss:$8 sps:$4 sm:$0xff]  }
  0x36   :  { %795 = vmatpush1.bf16.msra.mxu0 %v1478_v1  ;;  %v1484_v5 = vld [vmem:[#allocation5 + $0x60] ss:$8 sps:$4 sm:$0xff]   ;;  %835 = vmatprep.subr.bf16.mxu1 %v1479_v2  ;;  %v1485_v6 = vld [vmem:[#allocation5 + $0x164] ss:$8 sps:$4 sm:$0xff]   ;;  %v1488_v8 = vld [vmem:[#allocation5 + $0x54] ss:$8 sps:$4 sm:$0xff]  }
  0x37   :  { %836 = vmatpush1.bf16.msra.mxu1 %v1481_v3  ;;  %796 = vmatprep.subr.bf16.mxu0 %v1482_v4  ;;  %v1487_v7 = vld [vmem:[#allocation5 + $0x160] ss:$8 sps:$4 sm:$0xff]   ;;  %v1490_v9 = vld [vmem:[#allocation5 + $0x50] ss:$8 sps:$4 sm:$0xff]   ;;  %v1491_v10 = vld [vmem:[#allocation5 + $0x154] ss:$8 sps:$4 sm:$0xff]  }
  0x38   :  { %837 = vmatprep.subr.bf16.mxu1 %v1485_v6  ;;  %v1494_v11 = vld [vmem:[#allocation5 + $0x44] ss:$8 sps:$4 sm:$0xff]   ;;  %v1493_v12 = vld [vmem:[#allocation5 + $0x150] ss:$8 sps:$4 sm:$0xff]   ;;  %v1496_v14 = vld [vmem:[#allocation5 + $0x40] ss:$8 sps:$4 sm:$0xff]  }
  0x39   :  { %v1497_v13 = vld [vmem:[#allocation5 + $0x144] ss:$8 sps:$4 sm:$0xff]   ;;  %v1500_v15 = vld [vmem:[#allocation5 + $0x34] ss:$8 sps:$4 sm:$0xff]   ;;  %v1499_v16 = vld [vmem:[#allocation5 + $0x140] ss:$8 sps:$4 sm:$0xff]  }
  0x3a   :  { %797 = vmatpush1.bf16.msra.mxu0 %v1484_v5  ;;  %v1503_v17 = vld [vmem:[#allocation5 + $0x134] ss:$8 sps:$4 sm:$0xff]   ;;  %v1502_v18 = vld [vmem:[#allocation5 + $0x30] ss:$8 sps:$4 sm:$0xff]   ;;  %v1506_v19 = vld [vmem:[#allocation5 + $0x24] ss:$8 sps:$4 sm:$0xff]  }
  0x3b   :  { %798 = vmatprep.subr.bf16.mxu0 %v1488_v8  ;;  %838 = vmatpush1.bf16.msra.mxu1 %v1487_v7  ;;  %v1505_v20 = vld [vmem:[#allocation5 + $0x130] ss:$8 sps:$4 sm:$0xff]   ;;  %v1509_v21 = vld [vmem:[#allocation5 + $0x124] ss:$8 sps:$4 sm:$0xff]   ;;  %v1508_v22 = vld [vmem:[#allocation5 + $0x20] ss:$8 sps:$4 sm:$0xff]  }
  0x3c   :  { %839 = vmatprep.subr.bf16.mxu1 %v1491_v10  ;;  %v1512_v23 = vld [vmem:[#allocation5 + $0x14] ss:$8 sps:$4 sm:$0xff]   ;;  %v1511_v24 = vld [vmem:[#allocation5 + $0x120] ss:$8 sps:$4 sm:$0xff]   ;;  %v1514_v26 = vld [vmem:[#allocation5 + $0x10] ss:$8 sps:$4 sm:$0xff]  }
  0x3d   :  { %v1515_v25 = vld [vmem:[#allocation5 + $0x114] ss:$8 sps:$4 sm:$0xff]   ;;  %v1518_v27 = vld [vmem:[#allocation5 + $0x4] ss:$8 sps:$4 sm:$0xff]   ;;  %v1517_v28 = vld [vmem:[#allocation5 + $0x110] ss:$8 sps:$4 sm:$0xff]  }
  0x3e   :  { %799 = vmatpush1.bf16.msra.mxu0 %v1490_v9  ;;  %v1521_v29 = vld [vmem:[#allocation5 + $0x104] ss:$8 sps:$4 sm:$0xff]   ;;  %v1520_v30 = vld [vmem:[#allocation5] ss:$8 sps:$4 sm:$0xff]   ;;  %v1524_v31 = vld [vmem:[#allocation5 + $0xf4] ss:$8 sps:$4 sm:$0xff]  }
  0x3f   :  { %800 = vmatprep.subr.bf16.mxu0 %v1494_v11  ;;  %840 = vmatpush1.bf16.msra.mxu1 %v1493_v12  ;;  %v1523_v32 = vld [vmem:[#allocation5 + $0x100] ss:$8 sps:$4 sm:$0xff]   ;;  %v1527_v33 = vld [vmem:[#allocation5 + $0x1f4] ss:$8 sps:$4 sm:$0xff]   ;;  %v1526_v34 = vld [vmem:[#allocation5 + $0xf0] ss:$8 sps:$4 sm:$0xff]  }
  0x40   :  { %841 = vmatprep.subr.bf16.mxu1 %v1497_v13  ;;  %v1530_v35 = vld [vmem:[#allocation5 + $0xe4] ss:$8 sps:$4 sm:$0xff]   ;;  %v1529_v36 = vld [vmem:[#allocation5 + $0x1f0] ss:$8 sps:$4 sm:$0xff]   ;;  %v1532_v38 = vld [vmem:[#allocation5 + $0xe0] ss:$8 sps:$4 sm:$0xff]  }
  0x41   :  { %v1533_v37 = vld [vmem:[#allocation5 + $0x1e4] ss:$8 sps:$4 sm:$0xff]   ;;  %v1536_v39 = vld [vmem:[#allocation5 + $0xd4] ss:$8 sps:$4 sm:$0xff]   ;;  %v1535_v40 = vld [vmem:[#allocation5 + $0x1e0] ss:$8 sps:$4 sm:$0xff]  }
  0x42   :  { %801 = vmatpush1.bf16.msra.mxu0 %v1496_v14  ;;  %v1539_v41 = vld [vmem:[#allocation5 + $0x1d4] ss:$8 sps:$4 sm:$0xff]   ;;  %v1538_v42 = vld [vmem:[#allocation5 + $0xd0] ss:$8 sps:$4 sm:$0xff]   ;;  %v1542_v43 = vld [vmem:[#allocation5 + $0xc4] ss:$8 sps:$4 sm:$0xff]  }
  0x43   :  { %802 = vmatprep.subr.bf16.mxu0 %v1500_v15  ;;  %842 = vmatpush1.bf16.msra.mxu1 %v1499_v16  ;;  %v1541_v44 = vld [vmem:[#allocation5 + $0x1d0] ss:$8 sps:$4 sm:$0xff]   ;;  %v1545_v45 = vld [vmem:[#allocation5 + $0x1c4] ss:$8 sps:$4 sm:$0xff]   ;;  %v1544_v47 = vld [vmem:[#allocation5 + $0xc0] ss:$8 sps:$4 sm:$0xff]  }
  0x44   :  { %843 = vmatprep.subr.bf16.mxu1 %v1503_v17  ;;  %v81_v46 = vld [vmem:[#allocation2] sm:$0xff]  ;;  %v1548_v49 = vld [vmem:[#allocation5 + $0xb4] ss:$8 sps:$4 sm:$0xff]   ;;  %v82_v50 = vld [vmem:[#allocation2 + $0x8] sm:$0xff]  ;;  %v1791_v15 = vmov 0   ;;  %vm1793_vm0 = vmmov 0  }
  0x45   :  { %v1269_v48 = vcombine.high %v81_v46, %v81_v46  ;;  %v1547_v51 = vld [vmem:[#allocation5 + $0x1c0] ss:$8 sps:$4 sm:$0xff]   ;;  %v1271_v52 = vcombine.high %v82_v50, %v82_v50  ;;  %v1551_v53 = vld [vmem:[#allocation5 + $0x1b4] ss:$8 sps:$4 sm:$0xff]   ;;  %v1550_v54 = vld [vmem:[#allocation5 + $0xb0] ss:$8 sps:$4 sm:$0xff]   ;;  %v1268_v5 = vcombine.low %v81_v46, %v81_v46  ;;  %v1270_v8 = vcombine.low %v82_v50, %v82_v50 }
  0x46   :  { %803 = vmatpush1.bf16.msra.mxu0 %v1502_v18  ;;  %v1554_v55 = vld [vmem:[#allocation5 + $0xa4] ss:$8 sps:$4 sm:$0xff]   ;;  %v1553_v56 = vld [vmem:[#allocation5 + $0x1b0] ss:$8 sps:$4 sm:$0xff]   ;;  %v1556_v58 = vld [vmem:[#allocation5 + $0xa0] ss:$8 sps:$4 sm:$0xff]  }
  0x47   :  { %804 = vmatprep.subr.bf16.mxu0 %v1506_v19  ;;  %844 = vmatpush1.bf16.msra.mxu1 %v1505_v20  ;;  %v1557_v57 = vld [vmem:[#allocation5 + $0x1a4] ss:$8 sps:$4 sm:$0xff]   ;;  %v1560_v59 = vld [vmem:[#allocation5 + $0x94] ss:$8 sps:$4 sm:$0xff]   ;;  %v1559_v60 = vld [vmem:[#allocation5 + $0x1a0] ss:$8 sps:$4 sm:$0xff]  }
  0x48   :  { %845 = vmatprep.subr.bf16.mxu1 %v1509_v21  ;;  %826 = vmatprep.mubr.bf16.mxu0 %v1269_v48  ;;  %v1563_v61 = vld [vmem:[#allocation5 + $0x194] ss:$8 sps:$4 sm:$0xff]   ;;  %v1562_v62 = vld [vmem:[#allocation5 + $0x90] ss:$8 sps:$4 sm:$0xff]   ;;  %v1566_v63 = vld [vmem:[#allocation5 + $0x84] ss:$8 sps:$4 sm:$0xff]  }
  0x49   :  { %867 = vmatprep.mubr.bf16.mxu1 %v1271_v52  ;;  %v1565_v0 = vld [vmem:[#allocation5 + $0x190] ss:$8 sps:$4 sm:$0xff]   ;;  %v1569_v1 = vld [vmem:[#allocation5 + $0x184] ss:$8 sps:$4 sm:$0xff]   ;;  %v1568_v2 = vld [vmem:[#allocation5 + $0x80] ss:$8 sps:$4 sm:$0xff]  }
  0x4a   :  { %805 = vmatpush1.bf16.msra.mxu0 %v1508_v22  ;;  %v1576_v3 = vld [vmem:[#allocation5 + $0x274] ss:$8 sps:$4 sm:$0xff]   ;;  %v1573_v4 = vld [vmem:[#allocation5 + $0x180] ss:$8 sps:$4 sm:$0xff]   ;;  %v1574_v7 = vld [vmem:[#allocation5 + $0x270] ss:$8 sps:$4 sm:$0xff]  }
  0x4b   :  { %806 = vmatprep.subr.bf16.mxu0 %v1512_v23  ;;  %846 = vmatpush1.bf16.msra.mxu1 %v1511_v24  ;;  %v1602_v6 = vld [vmem:[#allocation5 + $0x374] ss:$8 sps:$4 sm:$0xff]   ;;  %v1581_v9 = vld [vmem:[#allocation5 + $0x264] ss:$8 sps:$4 sm:$0xff]   ;;  %v1600_v10 = vld [vmem:[#allocation5 + $0x370] ss:$8 sps:$4 sm:$0xff]  }
  0x4c   :  { %847 = vmatprep.subr.bf16.mxu1 %v1515_v25  ;;  %v1608_v11 = vld [vmem:[#allocation5 + $0x364] ss:$8 sps:$4 sm:$0xff]   ;;  %v1579_v12 = vld [vmem:[#allocation5 + $0x260] ss:$8 sps:$4 sm:$0xff]   ;;  %v1584_v13 = vld [vmem:[#allocation5 + $0x254] ss:$8 sps:$4 sm:$0xff]  }
  0x4d   :  { %v1606_v14 = vld [vmem:[#allocation5 + $0x360] ss:$8 sps:$4 sm:$0xff]   ;;  %v1614_v16 = vld [vmem:[#allocation5 + $0x354] ss:$8 sps:$4 sm:$0xff]   ;;  %v1582_v17 = vld [vmem:[#allocation5 + $0x250] ss:$8 sps:$4 sm:$0xff]  }
  0x4e   :  { %807 = vmatpush1.bf16.msra.mxu0 %v1514_v26  ;;  %v1587_v18 = vld [vmem:[#allocation5 + $0x244] ss:$8 sps:$4 sm:$0xff]   ;;  %v1585_v19 = vld [vmem:[#allocation5 + $0x240] ss:$8 sps:$4 sm:$0xff]   ;;  %v1612_v20 = vld [vmem:[#allocation5 + $0x350] ss:$8 sps:$4 sm:$0xff]  }
  0x4f   :  { %808 = vmatprep.subr.bf16.mxu0 %v1518_v27  ;;  %848 = vmatpush1.bf16.msra.mxu1 %v1517_v28  ;;  %v1620_v21 = vld [vmem:[#allocation5 + $0x344] ss:$8 sps:$4 sm:$0xff]   ;;  %v1590_v22 = vld [vmem:[#allocation5 + $0x234] ss:$8 sps:$4 sm:$0xff]   ;;  %v1618_v23 = vld [vmem:[#allocation5 + $0x340] ss:$8 sps:$4 sm:$0xff]  }
  0x50   :  { %849 = vmatprep.subr.bf16.mxu1 %v1521_v29  ;;  %v1626_v24 = vld [vmem:[#allocation5 + $0x334] ss:$8 sps:$4 sm:$0xff]   ;;  %v1588_v26 = vld [vmem:[#allocation5 + $0x230] ss:$8 sps:$4 sm:$0xff]   ;;  %v1593_v28 = vld [vmem:[#allocation5 + $0x224] ss:$8 sps:$4 sm:$0xff]  }
  0x51   :  { %v1847_v25 = vld [vmem:[#allocation2 + $0x10] sm:$0xff]  ;;  %v1623_v48 = vld [vmem:[#allocation5 + $0x2c4] ss:$8 sps:$4 sm:$0xff]   ;;  %s1794_s26 = smov [#allocation10]  }
  0x52   :  { %809 = vmatpush1.bf16.msra.mxu0 %v1520_v30  ;;  %v1273_v27 = vcombine.high %v1847_v25, %v1847_v25  ;;  %v1624_v29 = vld [vmem:[#allocation5 + $0x330] ss:$8 sps:$4 sm:$0xff]   ;;  %v1632_v30 = vld [vmem:[#allocation5 + $0x324] ss:$8 sps:$4 sm:$0xff]   ;;  %v1617_v46 = vld [vmem:[#allocation5 + $0x2d4] ss:$8 sps:$4 sm:$0xff]  }
  0x53   :  { %810 = vmatprep.subr.bf16.mxu0 %v1524_v31  ;;  %850 = vmatpush1.bf16.msra.mxu1 %v1523_v32  ;;  %v1591_v31 = vld [vmem:[#allocation5 + $0x220] ss:$8 sps:$4 sm:$0xff]   ;;  %v1596_v32 = vld [vmem:[#allocation5 + $0x214] ss:$8 sps:$4 sm:$0xff]   ;;  %v1635_v52 = vld [vmem:[#allocation5 + $0x2a4] ss:$8 sps:$4 sm:$0xff]  }
  0x54   :  { %851 = vmatprep.subr.bf16.mxu1 %v1527_v33  ;;  %v1630_v33 = vld [vmem:[#allocation5 + $0x320] ss:$8 sps:$4 sm:$0xff]   ;;  %v1629_v50 = vld [vmem:[#allocation5 + $0x2b4] ss:$8 sps:$4 sm:$0xff]   ;;  %s1257_s27 = sshll.u32 %s1794_s26, 4  ;;  %s1258_s27 = int_to_ptr.vmem [resolvable:$true] %s1257_s27 }
  0x55   :  { %p1760_p7 = scmp.lt.s32.totalorder %s1258_s27, %s1258_s27 }
  0x56   :  { %811 = vmatpush2.bf16.msra.mxu0 %v1526_v34  ;;  %v1638_v34 = vld [vmem:[#allocation5 + $0x314] ss:$8 sps:$4 sm:$0xff]  }
  0x57   :  { %812 = vmatprep.subr.bf16.mxu0 %v1530_v35  ;;  %852 = vmatpush2.bf16.msra.mxu1 %v1529_v36  ;;  %v1594_v35 = vld [vmem:[#allocation5 + $0x210] ss:$8 sps:$4 sm:$0xff]   ;;  %v1599_v36 = vld [vmem:[#allocation5 + $0x204] ss:$8 sps:$4 sm:$0xff]  }
  0x58   :  { %853 = vmatprep.subr.bf16.mxu1 %v1533_v37  ;;  %v1636_v37 = vld [vmem:[#allocation5 + $0x310] ss:$8 sps:$4 sm:$0xff]  }
  0x5a   :  { %813 = vmatpush2.bf16.msra.mxu0 %v1532_v38  ;;  %v1644_v38 = vld [vmem:[#allocation5 + $0x304] ss:$8 sps:$4 sm:$0xff]  }
  0x5b   :  { %814 = vmatprep.subr.bf16.mxu0 %v1536_v39  ;;  %854 = vmatpush2.bf16.msra.mxu1 %v1535_v40  ;;  %v1597_v39 = vld [vmem:[#allocation5 + $0x200] ss:$8 sps:$4 sm:$0xff]   ;;  %v1605_v40 = vld [vmem:[#allocation5 + $0x2f4] ss:$8 sps:$4 sm:$0xff]  }
  0x5c   :  { %855 = vmatprep.subr.bf16.mxu1 %v1539_v41  ;;  %v1642_v41 = vld [vmem:[#allocation5 + $0x300] ss:$8 sps:$4 sm:$0xff]  }
  0x5e   :  { %815 = vmatpush2.bf16.msra.mxu0 %v1538_v42  ;;  %v1603_v42 = vld [vmem:[#allocation5 + $0x2f0] ss:$8 sps:$4 sm:$0xff]  }
  0x5f   :  { %816 = vmatprep.subr.bf16.mxu0 %v1542_v43  ;;  %856 = vmatpush2.bf16.msra.mxu1 %v1541_v44  ;;  %v1611_v43 = vld [vmem:[#allocation5 + $0x2e4] ss:$8 sps:$4 sm:$0xff]   ;;  %v1648_v44 = vld [vmem:[#allocation2 + $0x18] ss:$0 sps:$4 sm:$0xff]  }
  0x60   :  { %857 = vmatprep.subr.bf16.mxu1 %v1545_v45  ;;  %v1609_v45 = vld [vmem:[#allocation5 + $0x2e0] ss:$8 sps:$4 sm:$0xff]  }
  0x62   :  { %817 = vmatpush2.bf16.msra.mxu0 %v1544_v47  ;;  %v1615_v47 = vld [vmem:[#allocation5 + $0x2d0] ss:$8 sps:$4 sm:$0xff]  }
  0x63   :  { %818 = vmatprep.subr.bf16.mxu0 %v1548_v49  ;;  %858 = vmatpush2.bf16.msra.mxu1 %v1547_v51  ;;  %v1621_v49 = vld [vmem:[#allocation5 + $0x2c0] ss:$8 sps:$4 sm:$0xff]   ;;  %v1627_v51 = vld [vmem:[#allocation5 + $0x2b0] ss:$8 sps:$4 sm:$0xff]  }
  0x64   :  { %859 = vmatprep.subr.bf16.mxu1 %v1551_v53  ;;  %v1633_v53 = vld [vmem:[#allocation5 + $0x2a0] ss:$8 sps:$4 sm:$0xff]  }
  0x66   :  { %819 = vmatpush2.bf16.msra.mxu0 %v1550_v54  ;;  %v1641_v54 = vld [vmem:[#allocation5 + $0x294] ss:$8 sps:$4 sm:$0xff]  }
  0x67   :  { %820 = vmatprep.subr.bf16.mxu0 %v1554_v55  ;;  %860 = vmatpush2.bf16.msra.mxu1 %v1553_v56  ;;  %v1639_v55 = vld [vmem:[#allocation5 + $0x290] ss:$8 sps:$4 sm:$0xff]   ;;  %v1647_v56 = vld [vmem:[#allocation5 + $0x284] ss:$8 sps:$4 sm:$0xff]  }
  0x68   :  { %861 = vmatprep.subr.bf16.mxu1 %v1557_v57  ;;  %v1645_v57 = vld [vmem:[#allocation5 + $0x280] ss:$8 sps:$4 sm:$0xff]  }
  0x6a   :  { %821 = vmatpush2.bf16.msra.mxu0 %v1556_v58  ;;  %v1272_v58 = vcombine.low %v1847_v25, %v1847_v25 }
  0x6b   :  { %822 = vmatprep.subr.bf16.mxu0 %v1560_v59  ;;  %862 = vmatpush2.bf16.msra.mxu1 %v1559_v60  ;;  %v1651_v59 = vld [vmem:[#allocation7 + $0x78] sm:$0xff]  }
  0x6c   :  { %863 = vmatprep.subr.bf16.mxu1 %v1563_v61  ;;  %v1652_v60 = vld [vmem:[#allocation7 + $0x38] sm:$0xff]   ;;  %v1653_v61 = vld [vmem:[#allocation7 + $0x70] sm:$0xff]  }
  0x6e   :  { %823 = vmatpush2.bf16.msra.mxu0 %v1562_v62  ;;  %v1654_v62 = vld [vmem:[#allocation7 + $0x30] sm:$0xff]  }
  0x6f   :  { %824 = vmatprep.subr.bf16.mxu0 %v1566_v63  ;;  %864 = vmatpush2.bf16.msra.mxu1 %v1565_v0  ;;  %v1655_v63 = vld [vmem:[#allocation7 + $0x68] sm:$0xff]  }
  0x70   :  { %865 = vmatprep.subr.bf16.mxu1 %v1569_v1  ;;  %v1656_v0 = vld [vmem:[#allocation7 + $0x28] sm:$0xff]   ;;  %v1657_v1 = vld [vmem:[#allocation7 + $0x60] sm:$0xff]  }
  0x72   :  { %825 = vmatpush2.bf16.msra.mxu0 %v1568_v2  ;;  %v1658_v2 = vld [vmem:[#allocation7 + $0x20] sm:$0xff]  }
  0x73   :  { %876 = vmatprep.subr.bf16.mxu0 %v1576_v3  ;;  %866 = vmatpush2.bf16.msra.mxu1 %v1573_v4  ;;  %v1659_v3 = vld [vmem:[#allocation7 + $0x58] sm:$0xff]  }
  0x74   :  { %917 = vmatprep.subr.bf16.mxu1 %v1602_v6  ;;  %v1660_v4 = vld [vmem:[#allocation7 + $0x18] sm:$0xff]   ;;  %v1662_v6 = vld [vmem:[#allocation7 + $0x10] sm:$0xff]  }
  0x75   :  { %827 = vmatmul.mubr.bf16.vlgmr.msra.gmra.mxu0 %v1268_v5  ;;  %v1661_v5 = vld [vmem:[#allocation7 + $0x50] sm:$0xff]  }
  0x76   :  { %877 = vmatpush1.bf16.msra.mxu0 %v1574_v7  ;;  %868 = vmatmul.mubr.bf16.vlgmr.msra.gmra.mxu1 %v1270_v8  ;;  %v1663_v7 = vld [vmem:[#allocation7 + $0x48] sm:$0xff]  }
  0x77   :  { %878 = vmatprep.subr.bf16.mxu0 %v1581_v9  ;;  %918 = vmatpush1.bf16.msra.mxu1 %v1600_v10  ;;  %v1664_v8 = vld [vmem:[#allocation7 + $0x8] sm:$0xff]   ;;  %v1665_v9 = vld [vmem:[#allocation7 + $0x40] sm:$0xff]  }
  0x78   :  { %949 = vmatprep.mubr.bf16.mxu1 %v1791_v15  ;;  %919 = vmatprep.subr.bf16.mxu1 %v1608_v11  ;;  %v1666_v10 = vld [vmem:[#allocation7] sm:$0xff]   ;;  %v1667_v11 = vld [vmem:[#allocation8 + $0x38] sm:$0xff]  }
  0x79   :  { %908 = vmatprep.mubr.bf16.mxu0 %v1273_v27  ;;  %v1670_v15 = vld [vmem:[#allocation8 + $0x20] sm:$0xff]  }
  0x7a   :  { %879 = vmatpush1.bf16.msra.mxu0 %v1579_v12  ;;  %v1792_v12 = vmov 0.0  }
  0x7b   :  { %880 = vmatprep.subr.bf16.mxu0 %v1584_v13  ;;  %920 = vmatpush1.bf16.msra.mxu1 %v1606_v14  ;;  %v1668_v13 = vld [vmem:[#allocation8 + $0x30] sm:$0xff]   ;;  %v1669_v14 = vld [vmem:[#allocation8 + $0x28] sm:$0xff]  }
  0x7c   :  { %921 = vmatprep.subr.bf16.mxu1 %v1614_v16  ;;  %v1671_v16 = vld [vmem:[#allocation8 + $0x18] sm:$0xff]  }
  0x7e   :  { %881 = vmatpush1.bf16.msra.mxu0 %v1582_v17 }
  0x7f   :  { %882 = vmatprep.subr.bf16.mxu0 %v1587_v18  ;;  %922 = vmatpush1.bf16.msra.mxu1 %v1612_v20 }
  0x80   :  { %923 = vmatprep.subr.bf16.mxu1 %v1620_v21 }
  0x82   :  { %883 = vmatpush1.bf16.msra.mxu0 %v1585_v19 }
  0x83   :  { %884 = vmatprep.subr.bf16.mxu0 %v1590_v22  ;;  %924 = vmatpush1.bf16.msra.mxu1 %v1618_v23 }
  0x84   :  { %925 = vmatprep.subr.bf16.mxu1 %v1626_v24 }
  0x86   :  { %885 = vmatpush1.bf16.msra.mxu0 %v1588_v26 }
  0x87   :  { %886 = vmatprep.subr.bf16.mxu0 %v1593_v28  ;;  %926 = vmatpush1.bf16.msra.mxu1 %v1624_v29  ;;  %v199_v29 = vlaneseq }
  0x88   :  { %927 = vmatprep.subr.bf16.mxu1 %v1632_v30 }
  0x89   :  { %v200_v30 = vshrl.u32 %v199_v29, 7 }
  0x8a   :  { %887 = vmatpush1.bf16.msra.mxu0 %v1591_v31 }
  0x8b   :  { %888 = vmatprep.subr.bf16.mxu0 %v1596_v32  ;;  %928 = vmatpush1.bf16.msra.mxu1 %v1630_v33  ;;  %v201_v31 = vsub.s32 0, %v200_v30  ;;  %v197_v32 = vld [vmem:[%s1867_s2] sm:$0x3]  ;;  %v205_v33 = vsub.s32 1, %v200_v30 }
  0x8c   :  { %929 = vmatprep.subr.bf16.mxu1 %v1638_v34 }
  0x8d   :  { %v202_v34 = vrot.slane %v197_v32, %v201_v31 }
  0x8e   :  { %889 = vmatpush1.bf16.msra.mxu0 %v1594_v35  ;;  %v206_v35 = vrot.slane %v197_v32, %v205_v33 }
  0x8f   :  { %890 = vmatprep.subr.bf16.mxu0 %v1599_v36  ;;  %930 = vmatpush1.bf16.msra.mxu1 %v1636_v37 }
  0x90   :  { %931 = vmatprep.subr.bf16.mxu1 %v1644_v38 }
  0x92   :  { %891 = vmatpush1.bf16.msra.mxu0 %v1597_v39 }
  0x93   :  { %892 = vmatprep.subr.bf16.mxu0 %v1605_v40  ;;  %932 = vmatpush1.bf16.msra.mxu1 %v1642_v41 }
  0x94   :  { %1413 = vmatprep.subr.bf16.mxu1 %v1651_v59 }
  0x96   :  { %893 = vmatpush2.bf16.msra.mxu0 %v1603_v42  ;;  %950 = vmatmul.mubr.bf16.vlgmr.msra.gmra.mxu1 %v1648_v44 }
  0x97   :  { %894 = vmatprep.subr.bf16.mxu0 %v1611_v43  ;;  %1414 = vmatpush3.bf16.msra.mxu1 %v1652_v60 }
  0x98   :  { %1415 = vmatprep.subr.bf16.mxu1 %v1653_v61 }
  0x9a   :  { %895 = vmatpush2.bf16.msra.mxu0 %v1609_v45 }
  0x9b   :  { %896 = vmatprep.subr.bf16.mxu0 %v1617_v46  ;;  %1416 = vmatpush3.bf16.msra.mxu1 %v1654_v62 }
  0x9c   :  { %1417 = vmatprep.subr.bf16.mxu1 %v1655_v63 }
  0x9e   :  { %897 = vmatpush2.bf16.msra.mxu0 %v1615_v47 }
  0x9f   :  { %898 = vmatprep.subr.bf16.mxu0 %v1623_v48  ;;  %1418 = vmatpush3.bf16.msra.mxu1 %v1656_v0  ;;  %v1404_v0 = vld [vmem:[%s1871_s6] ss:$0 sm:$0xff] }
  0xa0   :  { %1419 = vmatprep.subr.bf16.mxu1 %v1657_v1 }
  0xa2   :  { %899 = vmatpush2.bf16.msra.mxu0 %v1621_v49 }
  0xa3   :  { %900 = vmatprep.subr.bf16.mxu0 %v1629_v50  ;;  %1420 = vmatpush3.bf16.msra.mxu1 %v1658_v2 }
  0xa4   :  { %1421 = vmatprep.subr.bf16.mxu1 %v1659_v3 }
  0xa6   :  { %901 = vmatpush2.bf16.msra.mxu0 %v1627_v51 }
  0xa7   :  { %902 = vmatprep.subr.bf16.mxu0 %v1635_v52  ;;  %1422 = vmatpush3.bf16.msra.mxu1 %v1660_v4  ;;  %v1672_v52 = vld [vmem:[#allocation8 + $0x10] sm:$0xff]  }
  0xa8   :  { %1423 = vmatprep.subr.bf16.mxu1 %v1661_v5 }
  0xaa   :  { %903 = vmatpush2.bf16.msra.mxu0 %v1633_v53  ;;  %v1673_v53 = vld [vmem:[#allocation8 + $0x8] sm:$0xff]  }
  0xab   :  { %904 = vmatprep.subr.bf16.mxu0 %v1641_v54  ;;  %1424 = vmatpush3.bf16.msra.mxu1 %v1662_v6  ;;  %v1674_v54 = vld [vmem:[#allocation8] sm:$0xff]  }
  0xac   :  { %1425 = vmatprep.subr.bf16.mxu1 %v1663_v7 }
  0xae   :  { %905 = vmatpush2.bf16.msra.mxu0 %v1639_v55 }
  0xaf   :  { %906 = vmatprep.subr.bf16.mxu0 %v1647_v56  ;;  %1426 = vmatpush3.bf16.msra.mxu1 %v1664_v8  ;;  %v1387_v56 = vld [vmem:[%s1869_s4] ss:$0 sm:$0xff]  ;;  %s1755_s4 = scalar_lea.vmem %s1258_s27, 128 }
  0xb0   :  { %1427 = vmatprep.subr.bf16.mxu1 %v1665_v9  ;;  %p1756_p6 = scmp.ne.s32.totalorder %s1258_s27, %s1755_s4  ;;  %p1761_p8 = scmp.lt.s32.totalorder %s1755_s4, %s1755_s4 }
  0xb2   :  { %907 = vmatpush2.bf16.msra.mxu0 %v1645_v57  ;;  %p1762_p9 = por %p1761_p8, %p1760_p7 }
  0xb3   :  { %1428 = vmatpush3.bf16.msra.mxu1 %v1666_v10  ;;  %1444 = vmatprep.subr.bf16.mxu0 %v1792_v12 }
  0xb4   :  { %p1763_p10 = pnand %p1762_p9, %p1756_p6 }
  0xb5   :  { %909 = vmatmul.mubr.bf16.vlgmr.msra.gmra.mxu0 %v1272_v58 }
  0xb6   :  { %1445 = vmatpush3.bf16.msra.mxu0 %v1667_v11  ;;  %1460 = vmatprep.mubr.msk.bf16.mxu0 %vm1793_vm0, %v1792_v12 }
  0xb7   :  { %1446 = vmatprep.subr.bf16.mxu0 %v1792_v12 }
  0xba   :  { %1447 = vmatpush3.bf16.msra.mxu0 %v1668_v13 }
  0xbb   :  { %1448 = vmatprep.subr.bf16.mxu0 %v1792_v12 }
  0xbe   :  { %1449 = vmatpush3.bf16.msra.mxu0 %v1669_v14 }
  0xbf   :  { %1450 = vmatprep.subr.bf16.mxu0 %v1792_v12 }
  0xc2   :  { %1451 = vmatpush3.bf16.msra.mxu0 %v1670_v15 }
  0xc3   :  { %1452 = vmatprep.subr.bf16.mxu0 %v1792_v12 }
  0xc6   :  { %1453 = vmatpush3.bf16.msra.mxu0 %v1671_v16 }
  0xc7   :  { %1454 = vmatprep.subr.bf16.mxu0 %v1792_v12 }
  0xca   :  { %1455 = vmatpush3.bf16.msra.mxu0 %v1672_v52 }
  0xcb   :  { %1456 = vmatprep.subr.bf16.mxu0 %v1792_v12 }
  0xce   :  { %1457 = vmatpush3.bf16.msra.mxu0 %v1673_v53 }
  0xcf   :  { %1458 = vmatprep.subr.bf16.mxu0 %v1792_v12 }
  0xd2   :  { %1459 = vmatpush3.bf16.msra.mxu0 %v1674_v54 }
 0x135   :  { %v828_v17 = vpop.f32.mrf.mxu0 }
 0x136   :  { %v869_v19 = vpop.f32.mrf.mxu1  ;;  %v829_v36 = vadd.f32 %v828_v17, %v202_v34 }
 0x137   :  { %v830_v18 = vpop.f32.mrf.mxu0 }
 0x138   :  { %v871_v21 = vpop.f32.mrf.mxu1  ;;  %v831_v37 = vadd.f32 %v830_v18, %v206_v35  ;;  %v870_v38 = vadd.f32 %v869_v19, %v829_v36 }
 0x139   :  { %v832_v20 = vpop.f32.mrf.mxu0 }
 0x13a   :  { %v873_v23 = vpop.f32.mrf.mxu1  ;;  %v872_v40 = vadd.f32 %v871_v21, %v831_v37 }
 0x13b   :  { %v833_v22 = vpop.f32.mrf.mxu0 }
 0x13c   :  { %v874_v24 = vpop.f32.mrf.mxu1 }
 0x156   :  { %v951_v25 = vpop.f32.mrf.mxu1 }
 0x158   :  { %v953_v26 = vpop.f32.mrf.mxu1 }
 0x15a   :  { %v955_v27 = vpop.f32.mrf.mxu1 }
 0x15c   :  { %v956_v28 = vpop.f32.mrf.mxu1 }
 0x175   :  { %v910_v39 = vpop.f32.mrf.mxu0 }
 0x176   :  { %v911_v41 = vadd.f32 %v910_v39, %v870_v38 }
 0x177   :  { %v912_v42 = vpop.f32.mrf.mxu0 }
 0x178   :  { %v952_v43 = vadd.f32 %v951_v25, %v911_v41  ;;  %v913_v44 = vadd.f32 %v912_v42, %v872_v40 }
 0x179   :  { %v914_v45 = vpop.f32.mrf.mxu0 }
 0x17a   :  { %v954_v46 = vadd.f32 %v953_v26, %v913_v44  ;;  %v958_v47 = vmax.f32 %v952_v43, 0.0 }
 0x17b   :  { %v915_v48 = vpop.f32.mrf.mxu0 }
 0x17c   :  { %v959_v49 = vmax.f32 %v954_v46, 0.0  ;;  %v960_v51 = vpack.c.bf16 %v958_v47, %v958_v47 }
 0x17e   :  { %v961_v50 = vpack.c.bf16 %v959_v49, %v959_v49 }
 0x180   :  { %1129 = vmatprep.mubr.bf16.mxu1 %v961_v50 }
 0x181   :  { %1130 = vmatmul.mubr.bf16.vlgmr.msra.gmra.mxu1 %v960_v51 }
 0x241   :  { %v1429_v55 = vpop.f32.mrf.mxu1 }
 0x243   :  { %v1430_v57 = vpop.f32.mrf.mxu1 }
 0x244   :  { %v1431_v58 = vadd.f32 %v1430_v57, %v1429_v55 }
 0x245   :  { %v1432_v59 = vpop.f32.mrf.mxu1 }
 0x246   :  { %v1132_v60 = vadd.f32 %v1431_v58, %v1387_v56 }
 0x247   :  { %v1433_v61 = vpop.f32.mrf.mxu1 }
 0x248   :  { %v1137_v62 = vmax.f32 %v1132_v60, 0.0 }
 0x24a   :  { %v1138_v63 = vpack.c.bf16 %v1137_v62, %v1137_v62 }
 0x24c   :  { %1461 = vmatmul.mubr.bf16.vlgmr.msra.gmra.mxu0 %v1138_v63 }
 0x30c   :  { %v1244_v1 = vpop.f32.mrf.mxu0 }
 0x30d   :  { %v1245_v2 = vadd.f32 %v1404_v0, %v1244_v1 }
 0x30e   :  { %v1462_v3 = vpop.f32.mrf.mxu0 }
 0x30f   :  { %1250 = vst [vmem:[#allocation10] sm:$0xff] %v1245_v2 }
 0x310   :  { %v1247_v4 = vpop.f32.mrf.mxu0 }
 0x311   :  { %1766 = shalt.err (!%p1763_p10)
}
 0x312   :  { %1260 = dma.vmem_to_hbm [thread:$0]  %s1258_s27, 128, %s1872_s7, [#allocation4]   ;;  %v1463_v5 = vpop.f32.mrf.mxu0 }
 0x313   :  { %1781 = dma.done.wait [#allocation4], 128  }
 0x314   :  { %1782 = vsyncadd [#allocation4], 4294967168 }
 0x315   :  { %1264 = vsyncpa [#allocation3], 1 }
 0x316   :  { %1265 = vsyncpa [#allocation6], 1 }
 0x317   :  { %1266 = vsyncpa [#allocation9], 1 }
 0x318   :  { %1267 = vsyncpa [#allocation4], 1 }

</bundles_post_ra>
